<compile_context>
chip_gen: v7x
topology: tpu7x:2x2x1
jax: 0.10.0
libtpu: 0.0.40
codegen_flags: <defaults>
</compile_context>

<pallas_src>
import jax
import jax.numpy as jnp
from jax.experimental import pallas as pl
from jax.experimental.pallas import tpu as pltpu

IN_FEATURES = 28 * 28   # 784
HIDDEN = 256


def discriminator_kernel(x_ref, w1_ref, b1_ref, w2_ref, b2_ref, w3_ref, b3_ref,
                         o_ref):
    # x_ref: (TB, 784) f32 -> bf16 cast fused here (saves a wrapper XLA pass
    # and the extra HBM round-trip for x).
    x = x_ref[...].astype(jnp.bfloat16)

    # Linear(784 -> 256) + LeakyReLU(0.2), f32 accumulation on the MXU.
    h1 = jnp.dot(x, w1_ref[...], preferred_element_type=jnp.float32)
    h1 = h1 + b1_ref[...]
    h1 = jnp.where(h1 > 0, h1, 0.2 * h1)

    # Linear(256 -> 256) + LeakyReLU(0.2).
    h2 = jnp.dot(h1.astype(jnp.bfloat16), w2_ref[...],
                 preferred_element_type=jnp.float32)
    h2 = h2 + b2_ref[...]
    h2 = jnp.where(h2 > 0, h2, 0.2 * h2)

    # Linear(256 -> 1): single output column -> VPU multiply + lane reduction
    # (keeps the MXU free).  b3 is a scalar read from SMEM.
    h3 = jnp.sum(h2 * w3_ref[...], axis=-1, keepdims=True) + b3_ref[0, 0]

    o_ref[...] = jax.nn.sigmoid(h3).astype(o_ref.dtype)


def _round_up(n, m):
    return ((n + m - 1) // m) * m


def _pick_tb(batch, tb_max=1024):
    """Largest batch tile that still yields >= 2 grid steps (when batch allows).

    Big tiles amortize the ~0.35 us per-grid-step overhead and push the x DMA
    toward the HBM roofline; >= 2 steps lets v7x shard the 'parallel' axis over
    both TensorCores and gives the pipeline something to overlap.
    """
    if batch >= 2 * tb_max:
        return tb_max
    half = pl.cdiv(batch, 2)
    granule = 128 if half >= 128 else 8
    return max(8, min(tb_max, _round_up(half, granule)))


def discriminator_forward(x, params, *, tb=None):
    """x: [B, 784] float32 (or bfloat16). params: output of prepare_params.
    Returns [B, 1] float32."""
    w1, b1, w2, b2, w3, b3 = params
    B = x.shape[0]
    if tb is None:
        tb = _pick_tb(B)
    n_tiles = pl.cdiv(B, tb)

    # Weights/biases: full-array blocks, constant index_map -> resident in VMEM.
    const = lambda a: pl.BlockSpec(a.shape, lambda i: (0,) * a.ndim)

    flops = 2 * B * (IN_FEATURES * HIDDEN + HIDDEN * HIDDEN + HIDDEN)
    bytes_accessed = (
        x.size * x.dtype.itemsize
        + sum(int(p.size) * p.dtype.itemsize for p in params)
        + B * 4
    )

    out = pl.pallas_call(
        discriminator_kernel,
        out_shape=jax.ShapeDtypeStruct((B, 1), jnp.float32),
        grid_spec=pltpu.PrefetchScalarGridSpec(
            num_scalar_prefetch=0,
            grid=(n_tiles,),
            in_specs=[
                pl.BlockSpec((tb, IN_FEATURES), lambda i: (i, 0)),   # x tiles
                const(w1), const(b1),
                const(w2), const(b2),
                const(w3),
                pl.BlockSpec(memory_space=pltpu.MemorySpace.SMEM),   # b3 scalar
            ],
            out_specs=pl.BlockSpec((tb, 1), lambda i: (i, 0)),
        ),
        compiler_params=pltpu.CompilerParams(
            dimension_semantics=("parallel",),   # megacore sharding on v7x
        ),
        cost_estimate=pl.CostEstimate(
            flops=flops,
            transcendentals=B,                    # sigmoid exp per row
            bytes_accessed=int(bytes_accessed),
        ),
    )(x, w1, b1, w2, b2, w3, b3)

    return out


def init_params(key):
    """f32 params mimicking nn.Linear default init (U(-1/sqrt(fan_in), ...)).
    Weights stored [in, out] (transposed vs. PyTorch)."""
    def linear(key, fan_in, fan_out):
        kw, kb = jax.random.split(key)
        bound = 1.0 / jnp.sqrt(fan_in)
        w = jax.random.uniform(kw, (fan_in, fan_out), jnp.float32, -bound, bound)
        b = jax.random.uniform(kb, (1, fan_out), jnp.float32, -bound, bound)
        return w, b

    k1, k2, k3 = jax.random.split(key, 3)
    w1, b1 = linear(k1, IN_FEATURES, HIDDEN)
    w2, b2 = linear(k2, HIDDEN, HIDDEN)
    w3, b3 = linear(k3, HIDDEN, 1)
    return (w1, b1, w2, b2, w3, b3)


def prepare_params(params):
    """Convert f32 math-layout params into the kernel layout:
    - w1 (784,256) and w2 (256,256) cast to bf16 (MXU operands; no K-pad)
    - w3 reshaped to a (1,256) f32 row for the VPU+XLU reduction
    - b1/b2 stay f32 (1,256); b3 is a (1,1) f32 scalar destined for SMEM."""
    w1, b1, w2, b2, w3, b3 = params
    w1p = w1.astype(jnp.bfloat16)
    w2p = w2.astype(jnp.bfloat16)
    w3p = w3.reshape(1, HIDDEN).astype(jnp.float32)
    b3p = b3.reshape(1, 1).astype(jnp.float32)
    return (w1p, b1, w2p, b2, w3p, b3p)


def reference_forward(x, params):
    """Pure-JAX f32 reference of the PyTorch module."""
    w1, b1, w2, b2, w3, b3 = params
    h = x @ w1 + b1
    h = jnp.where(h > 0, h, 0.2 * h)
    h = h @ w2 + b2
    h = jnp.where(h > 0, h, 0.2 * h)
    h = h @ w3 + b3
    return jax.nn.sigmoid(h)


if __name__ == "__main__":
    key = jax.random.PRNGKey(0)
    k_params, k_x = jax.random.split(key)

    params_f32 = init_params(k_params)
    params = prepare_params(params_f32)

    B = 64
    x = jax.random.normal(k_x, (B, IN_FEATURES), dtype=jnp.float32)

    out = discriminator_forward(x, params)   # B=64 -> tb=32, 2 grid steps
    out = jax.block_until_ready(out)

    ref = reference_forward(x, params_f32)
    assert out.shape == (B, 1), out.shape
    err = float(jnp.max(jnp.abs(out - ref)))
    # bf16 matmul operands (x/w1/w2) + the h1 f32->bf16 re-cast -> relaxed
    # tolerance vs. the f32 reference (fine for a GAN discriminator forward).
    assert err < 2e-2, f"max abs err {err}"

    print("KERNEL_OK")
</pallas_src>

<mosaic_0001>
module attributes {stable_mosaic.version = 11 : i64} {
  func.func @discriminator_kernel(%arg0: i32, %arg1: memref<32x784xf32, #tpu.memory_space<vmem>>, %arg2: memref<784x256xbf16, #tpu.memory_space<vmem>>, %arg3: memref<1x256xf32, #tpu.memory_space<vmem>>, %arg4: memref<256x256xbf16, #tpu.memory_space<vmem>>, %arg5: memref<1x256xf32, #tpu.memory_space<vmem>>, %arg6: memref<1x256xf32, #tpu.memory_space<vmem>>, %arg7: memref<1x1xf32, #tpu.memory_space<smem>>, %arg8: memref<32x1xf32, #tpu.memory_space<vmem>>) attributes {dimension_semantics = [#tpu.dimension_semantics<parallel>], iteration_bounds = array<i64: 2>, scalar_prefetch = 0 : i64, scratch_operands = 0 : i64, tpu.core_type = #tpu.core_type<tc>, window_params = [{transform_indices = @transform_0, window_bounds = array<i64: 32, 784>}, {pipeline_mode = #tpu.pipeline_mode<synchronous>, transform_indices = @transform_1, window_bounds = array<i64: 784, 256>}, {pipeline_mode = #tpu.pipeline_mode<synchronous>, transform_indices = @transform_2, window_bounds = array<i64: 1, 256>}, {pipeline_mode = #tpu.pipeline_mode<synchronous>, transform_indices = @transform_3, window_bounds = array<i64: 256, 256>}, {pipeline_mode = #tpu.pipeline_mode<synchronous>, transform_indices = @transform_4, window_bounds = array<i64: 1, 256>}, {pipeline_mode = #tpu.pipeline_mode<synchronous>, transform_indices = @transform_5, window_bounds = array<i64: 1, 256>}, {transform_indices = @transform_6, window_bounds = array<i64: 1, 1>}, {transform_indices = @transform_7, window_bounds = array<i64: 32, 1>}]} {
    %c0 = arith.constant 0 : index
    %c0_0 = arith.constant 0 : index
    %0 = vector.load %arg1[%c0, %c0_0] : memref<32x784xf32, #tpu.memory_space<vmem>>, vector<32x784xf32>
    %1 = arith.truncf %0 : vector<32x784xf32> to vector<32x784xbf16>
    %c0_1 = arith.constant 0 : index
    %c0_2 = arith.constant 0 : index
    %2 = vector.load %arg2[%c0_1, %c0_2] : memref<784x256xbf16, #tpu.memory_space<vmem>>, vector<784x256xbf16>
    %cst = arith.constant dense<0.000000e+00> : vector<32x256xf32>
    %3 = tpu.matmul %1, %2, %cst {dimension_numbers = #tpu.dot_dimension_numbers<[1], [0], [0], [1], [0, 0, 1, 1], [], []>} : vector<32x784xbf16>, vector<784x256xbf16>, vector<32x256xf32> -> vector<32x256xf32>
    %c0_3 = arith.constant 0 : index
    %c0_4 = arith.constant 0 : index
    %4 = vector.load %arg3[%c0_3, %c0_4] : memref<1x256xf32, #tpu.memory_space<vmem>>, vector<1x256xf32>
    %5 = vector.broadcast %4 : vector<1x256xf32> to vector<32x256xf32>
    %6 = arith.addf %3, %5 : vector<32x256xf32>
    %cst_5 = arith.constant 0.000000e+00 : f32
    %7 = vector.broadcast %cst_5 : f32 to vector<32x256xf32>
    %8 = arith.cmpf ogt, %6, %7 : vector<32x256xf32>
    %cst_6 = arith.constant 2.000000e-01 : f32
    %9 = vector.broadcast %cst_6 : f32 to vector<32x256xf32>
    %10 = arith.mulf %9, %6 : vector<32x256xf32>
    %11 = arith.select %8, %6, %10 : vector<32x256xi1>, vector<32x256xf32>
    %12 = arith.truncf %11 : vector<32x256xf32> to vector<32x256xbf16>
    %c0_7 = arith.constant 0 : index
    %c0_8 = arith.constant 0 : index
    %13 = vector.load %arg4[%c0_7, %c0_8] : memref<256x256xbf16, #tpu.memory_space<vmem>>, vector<256x256xbf16>
    %cst_9 = arith.constant dense<0.000000e+00> : vector<32x256xf32>
    %14 = tpu.matmul %12, %13, %cst_9 {dimension_numbers = #tpu.dot_dimension_numbers<[1], [0], [0], [1], [0, 0, 1, 1], [], []>} : vector<32x256xbf16>, vector<256x256xbf16>, vector<32x256xf32> -> vector<32x256xf32>
    %c0_10 = arith.constant 0 : index
    %c0_11 = arith.constant 0 : index
    %15 = vector.load %arg5[%c0_10, %c0_11] : memref<1x256xf32, #tpu.memory_space<vmem>>, vector<1x256xf32>
    %16 = vector.broadcast %15 : vector<1x256xf32> to vector<32x256xf32>
    %17 = arith.addf %14, %16 : vector<32x256xf32>
    %cst_12 = arith.constant 0.000000e+00 : f32
    %18 = vector.broadcast %cst_12 : f32 to vector<32x256xf32>
    %19 = arith.cmpf ogt, %17, %18 : vector<32x256xf32>
    %cst_13 = arith.constant 2.000000e-01 : f32
    %20 = vector.broadcast %cst_13 : f32 to vector<32x256xf32>
    %21 = arith.mulf %20, %17 : vector<32x256xf32>
    %22 = arith.select %19, %17, %21 : vector<32x256xi1>, vector<32x256xf32>
    %c0_14 = arith.constant 0 : index
    %c0_15 = arith.constant 0 : index
    %23 = vector.load %arg6[%c0_14, %c0_15] : memref<1x256xf32, #tpu.memory_space<vmem>>, vector<1x256xf32>
    %24 = vector.broadcast %23 : vector<1x256xf32> to vector<32x256xf32>
    %25 = arith.mulf %22, %24 : vector<32x256xf32>
    %cst_16 = arith.constant dense<0.000000e+00> : vector<32xf32>
    %26 = vector.multi_reduction <add>, %25, %cst_16 [1] : vector<32x256xf32> to vector<32xf32>
    %27 = vector.shape_cast %26 : vector<32xf32> to vector<32x1xf32>
    %c0_17 = arith.constant 0 : index
    %c0_18 = arith.constant 0 : index
    %28 = memref.load %arg7[%c0_17, %c0_18] : memref<1x1xf32, #tpu.memory_space<smem>>
    %29 = vector.broadcast %28 : f32 to vector<32x1xf32>
    %30 = arith.addf %27, %29 : vector<32x1xf32>
    %31 = arith.negf %30 : vector<32x1xf32>
    %32 = math.exp %31 : vector<32x1xf32>
    %cst_19 = arith.constant 1.000000e+00 : f32
    %33 = vector.broadcast %cst_19 : f32 to vector<32x1xf32>
    %34 = arith.addf %33, %32 : vector<32x1xf32>
    %35 = arith.divf %33, %34 : vector<32x1xf32>
    %c0_20 = arith.constant 0 : index
    %c0_21 = arith.constant 0 : index
    %36 = vector.load %arg8[%c0_20, %c0_21] : memref<32x1xf32, #tpu.memory_space<vmem>>, vector<32x1xf32>
    tpu.vector_store %arg8[%c0_20, %c0_21], %35 {strides = array<i32>} : memref<32x1xf32, #tpu.memory_space<vmem>>, vector<32x1xf32>,
    return
  }
  func.func @transform_0(%arg0: i32) -> (i32, i32) {
    %c0_i32 = arith.constant 0 : i32
    %c0_i32_0 = arith.constant 0 : i32
    return %arg0, %c0_i32 : i32, i32
  }
  func.func @transform_1(%arg0: i32) -> (i32, i32) {
    %c0_i32 = arith.constant 0 : i32
    %c0_i32_0 = arith.constant 0 : i32
    %c0_i32_1 = arith.constant 0 : i32
    return %c0_i32, %c0_i32_0 : i32, i32
  }
  func.func @transform_2(%arg0: i32) -> (i32, i32) {
    %c0_i32 = arith.constant 0 : i32
    %c0_i32_0 = arith.constant 0 : i32
    %c0_i32_1 = arith.constant 0 : i32
    return %c0_i32, %c0_i32_0 : i32, i32
  }
  func.func @transform_3(%arg0: i32) -> (i32, i32) {
    %c0_i32 = arith.constant 0 : i32
    %c0_i32_0 = arith.constant 0 : i32
    %c0_i32_1 = arith.constant 0 : i32
    return %c0_i32, %c0_i32_0 : i32, i32
  }
  func.func @transform_4(%arg0: i32) -> (i32, i32) {
    %c0_i32 = arith.constant 0 : i32
    %c0_i32_0 = arith.constant 0 : i32
    %c0_i32_1 = arith.constant 0 : i32
    return %c0_i32, %c0_i32_0 : i32, i32
  }
  func.func @transform_5(%arg0: i32) -> (i32, i32) {
    %c0_i32 = arith.constant 0 : i32
    %c0_i32_0 = arith.constant 0 : i32
    %c0_i32_1 = arith.constant 0 : i32
    return %c0_i32, %c0_i32_0 : i32, i32
  }
  func.func @transform_6(%arg0: i32) -> (i32, i32) {
    %c0_i32 = arith.constant 0 : i32
    %c0_i32_0 = arith.constant 0 : i32
    %c0_i32_1 = arith.constant 0 : i32
    return %c0_i32, %c0_i32_0 : i32, i32
  }
  func.func @transform_7(%arg0: i32) -> (i32, i32) {
    %c0_i32 = arith.constant 0 : i32
    %c0_i32_0 = arith.constant 0 : i32
    return %arg0, %c0_i32 : i32, i32
  }
}

</mosaic_0001>

<bundles_post_ra>
// kernel: tpu_custom_call.1
= control target key start
LH: loop header
LB: loop body
LE: loop exit
PB: predicated region body
PF: predicated region fallthrough
CT: control target
= control target key end

     0   :  { %s2523_s0 = inlined_call_operand.hbm [shape: f32[64,784], index: 0, kind: input, shape index: {}]   ;;  %s2524_s1 = inlined_call_operand.hbm [shape: bf16[784,256], index: 1, kind: input, shape index: {}]   ;;  %s2525_s2 = inlined_call_operand.vmem [shape: f32[1,256], index: 2, kind: input, shape index: {}]   ;;  %s2526_s3 = inlined_call_operand.hbm [shape: bf16[256,256], index: 3, kind: input, shape index: {}]   ;;  %s2527_s4 = inlined_call_operand.vmem [shape: f32[1,256], index: 4, kind: input, shape index: {}]   ;;  %s2528_s5 = inlined_call_operand.vmem [shape: f32[1,256], index: 5, kind: input, shape index: {}]   ;;  %s2529_s6 = inlined_call_operand.<no memory space> [shape: f32[1,1], index: 6, kind: input, shape index: {}]   ;;  %s2530_s7 = inlined_call_operand.vmem [shape: f32[64,1], index: 7, kind: output, shape index: {}]  }
   0x1   :  { %12 = sst [smem:[#allocation2]] %s2529_s6 }
   0x2   :  { %13 = vsyncpa [#allocation4], 0 }
   0x3   :  { %15 = vsyncpa [#allocation4 + $0x1], 0 }
   0x4   :  { %16 = vsyncpa [#allocation6], 0  ;;  %s2296_s26 = smov 0   ;;  %s2298_s27 = smov 0  }
   0x5   :  { %s2300_s28 = smov 0   ;;  %s2302_s29 = smov 0  }
   0x6 LB: > { %s1656_s6 = sadd.s32 4294967295, %s2243_s29   ;;  %p42_p0 = scmp.ne.s32.totalorder %s2235_s27, %s2231_s26  ;;  %s2243_s29 = sphi %s2302_s29, %s2546_s29   ;;  %s2239_s28 = sphi %s2300_s28, %s2545_s28   ;;  %s2235_s27 = sphi %s2298_s27, %s2544_s27   ;;  %s2231_s26 = sphi %s2296_s26, %s2543_s26  }
   0x7   : > { %p2318_p1 = scmp.eq.s32.totalorder %s1656_s6, 0  ;;  %p1658_p2 = scmp.ge.s32.totalorder %s2243_s29, 1 }
   0x8   : > { %p205_p3 = scmp.lt.s32.totalorder %s2243_s29, 3  ;;  %s2245_s10 = smov [#allocation5]  }
   0x9   : > { %s2535_s30 = scalar_select %p2318_p1, 1, 0 }
   0xa   : > { %p2326_p4 = por %p2318_p1, %p42_p0  ;;  %p2330_p5 = pnand %p1658_p2, %p205_p3 }
   0xb   : > { %s217_s11 = sshll.u32 %s2245_s10, 4  ;;  %s2246_s13 = smov [#allocation7]   ;;  %s218_s11 = int_to_ptr.vmem [resolvable:$true] %s217_s11 }
   0xc   : > { %s2536_s8 = scalar_select %p2326_p4, 1, 0 }
   0xd   : > { %s2537_s9 = scalar_select %p2330_p5, 1, 0 }
   0xe   : > { %p1853_p6 = pneg %p2330_p5  ;;  %s233_s14 = sshll.u32 %s2246_s13, 4  ;;  %s2342_s14 = int_to_ptr.vmem [resolvable:$true] %s233_s14 }
   0xf   : > { %s2119_s17 = scalar_lea.hbm %s2524_s1, 12544 }
  0x10   : > { %p2338_p7 = pnand %p1853_p6, %p2318_p1  ;;  %p2120_p8 = scmp.ne.s32.totalorder %s2524_s1, %s2119_s17 }
  0x11   : > { %p2126_p12 = scmp.lt.u32.totalorder %s2119_s17, %s2524_s1 }
  0x12   : > { %p2121_p9 = pneg %p2338_p7 }
  0x14   : > { %p2122_p10 = pnand %p2121_p9, %p2120_p8 }
  0x16   : > { %p2123_p11 = pneg %p2122_p10 }
  0x18   : > { %p2128_p13 = pnand %p2126_p12, %p2123_p11 }
  0x1a   : > { %2131 = shalt.err (!%p2128_p13)
}
  0x1b   : > { %s2132_s22 = scalar_lea.vmem %s218_s11, 12544  ;;  %p2140_p6 = scmp.lt.s32.totalorder %s218_s11, %s218_s11 }
  0x1c   : > { %p2133_p0 = scmp.ne.s32.totalorder %s218_s11, %s2132_s22  ;;  %p2141_p1 = scmp.lt.s32.totalorder %s2132_s22, %s2132_s22 }
  0x1e   : > { %p2135_p2 = pnand %p2133_p0, %p2121_p9  ;;  %p2142_p4 = por %p2141_p1, %p2140_p6 }
  0x20   : > { %p2136_p3 = pneg %p2135_p2 }
  0x22   : > { %p2143_p5 = pnand %p2142_p4, %p2136_p3 }
  0x24   : > { %2146 = shalt.err (!%p2143_p5)
}
  0x25   : > { %s2247_s23 = smov 128   ;;  %s2248_s24 = smov 8  }
  0x26   : > { %1856 = dma.hbm_to_vmem [thread:$0]  (!%p2338_p7), %s2524_s1, 12544, %s218_s11, [#allocation6], %s2247_s23, %s2247_s23, %s2248_s24  }
  0x27   : > { %s2147_s15 = scalar_lea.hbm %s2526_s3, 4096 }
  0x28   : > { %p2148_p8 = scmp.ne.s32.totalorder %s2526_s3, %s2147_s15  ;;  %p2154_p5 = scmp.lt.u32.totalorder %s2147_s15, %s2526_s3 }
  0x2a   : > { %p2150_p1 = pnand %p2148_p8, %p2121_p9 }
  0x2c   : > { %p2151_p4 = pneg %p2150_p1 }
  0x2e   : > { %p2156_p10 = pnand %p2154_p5, %p2151_p4 }
  0x30   : > { %2159 = shalt.err (!%p2156_p10)
}
  0x31   : > { %s2160_s11 = scalar_lea.vmem %s2342_s14, 4096  ;;  %p2168_p0 = scmp.lt.s32.totalorder %s2342_s14, %s2342_s14 }
  0x32   : > { %p2161_p11 = scmp.ne.s32.totalorder %s2342_s14, %s2160_s11  ;;  %p2169_p2 = scmp.lt.s32.totalorder %s2160_s11, %s2160_s11 }
  0x34   : > { %p2163_p12 = pnand %p2161_p11, %p2121_p9  ;;  %p2170_p3 = por %p2169_p2, %p2168_p0 }
  0x36   : > { %p2164_p13 = pneg %p2163_p12 }
  0x38   : > { %p2171_p6 = pnand %p2170_p3, %p2164_p13 }
  0x3a   : > { %2174 = shalt.err (!%p2171_p6)
}
  0x3b   : > { %1859 = dma.hbm_to_vmem [thread:$0]  (!%p2338_p7), %s2526_s3, 4096, %s2342_s14, [#allocation6], %s2247_s23, %s2247_s23, %s2248_s24  }
  0x3c   : > { %s2392_s22 = sadd.s32 1, %s2243_s29   ;;  %s29_s25 = sadd.s32 1, %s2239_s28 }
  0x3d   : > { %s26_s12 = ssub.s32 %s2243_s29, %s2392_s22  ;;  %p36_p9 = scmp.ne.s32.totalorder %s2239_s28, %s2235_s27 }
  0x3e   : > { %p27_p8 = scmp.eq.s32.totalorder %s26_s12, 0  ;;  %p37_p1 = scmp.eq.s32.totalorder %s2243_s29, 0 }
  0x3f   : > { %p1866_p4 = scmp.lt.s32.totalorder %s2243_s29, 2  ;;  %s256_s26 = sand.u32 1, %s2239_s28  }
  0x40   : > { %s2403_s10 = scalar_select %p27_p8, %s2239_s28, %s29_s25  }
  0x41   : > { %p38_p5 = por %p37_p1, %p36_p9  ;;  %s1840_s13 = smul.u32 224, %s256_s26 }
  0x42   : > { %s1841_s15 = smul.u32 3584, %s2243_s29  ;;  %s2417_s19 = scalar_lea.sflag [#allocation4], %s256_s26 }
  0x43   : > { %p2406_p10 = pnand %p1866_p4, %p38_p5  ;;  %s260_s17 = scalar_lea.vmem [#allocation3], %s1840_s13 }
  0x44   : > { %s2413_s24 = scalar_lea.hbm %s2523_s0, %s1841_s15  ;;  %s268_s18 = sshll.u32 %s260_s17, 4  ;;  %s2415_s18 = int_to_ptr.vmem [resolvable:$true] %s268_s18 }
  0x45   : > { %s2175_s11 = scalar_lea.hbm %s2413_s24, 3584  ;;  %p2177_p11 = pneg %p2406_p10 }
  0x46   : > { %p2176_p7 = scmp.ne.s32.totalorder %s2413_s24, %s2175_s11  ;;  %s2180_s25 = scalar_lea.hbm %s2523_s0, 7168 }
  0x47   : > { %p2181_p0 = scmp.lt.u32.totalorder %s2413_s24, %s2523_s0  ;;  %p2182_p2 = scmp.lt.u32.totalorder %s2180_s25, %s2175_s11 }
  0x48   : > { %p2178_p12 = pnand %p2177_p11, %p2176_p7  ;;  %p2184_p6 = scmp.lt.u32.totalorder %s2175_s11, %s2413_s24 }
  0x49   : > { %p2183_p3 = por %p2182_p2, %p2181_p0 }
  0x4a   : > { %p2179_p13 = pneg %p2178_p12 }
  0x4b   : > { %p2185_p9 = por %p2184_p6, %p2183_p3 }
  0x4d   : > { %p2186_p8 = pnand %p2185_p9, %p2179_p13 }
  0x4f   : > { %2189 = shalt.err (!%p2186_p8)
}
  0x50   : > { %s2190_s26 = scalar_lea.vmem %s2415_s18, 3584  ;;  %s2249_s13 = smov [#allocation3]  }
  0x51   : > { %p2191_p1 = scmp.ne.s32.totalorder %s2415_s18, %s2190_s26  ;;  %s2195_s14 = sshll.u32 %s2249_s13, 4  ;;  %s2196_s14 = int_to_ptr.vmem [resolvable:$false] %s2195_s14 }
  0x52   : > { %s2197_s23 = scalar_lea.vmem %s2196_s14, 7168  ;;  %p2198_p7 = scmp.lt.s32.totalorder %s2415_s18, %s2196_s14 }
  0x53   : > { %p2193_p4 = pnand %p2191_p1, %p2177_p11  ;;  %p2199_p12 = scmp.lt.s32.totalorder %s2197_s23, %s2190_s26 }
  0x55   : > { %p2194_p5 = pneg %p2193_p4  ;;  %p2200_p0 = por %p2199_p12, %p2198_p7 }
  0x57   : > { %p2201_p2 = pnand %p2200_p0, %p2194_p5 }
  0x59   : > { %2204 = shalt.err (!%p2201_p2)
}
  0x5a   : > { %s2250_s17 = smov 896   ;;  %s2251_s11 = smov 56  }
  0x5b   : > { %1863 = dma.hbm_to_vmem [thread:$0]  (!%p2406_p10), %s2413_s24, 3584, %s2415_s18, %s2417_s19, %s2250_s17, %s2250_s17, %s2251_s11  }
  0x5c   : > { %p2540_p11 = scmp.ne.s32.totalorder %s2537_s9, 0 }
  0x5d   : > { %s282_s20 = sand.u32 (!%p2540_p11), 1, %s2235_s27   ;;  %p2541_p13 = scmp.ne.s32.totalorder (!%p2540_p11), %s2536_s8, 0 }
  0x5e   : > { %280 = sbr.rel (%p2540_p11) target bundleno = 878 (0x36e), region = 48  ;;  %s283_s25 = scalar_lea.sflag (!%p2540_p11), [#allocation4], %s282_s20 }
  0x5f   : > { %s1842_s21 = smul.u32 (!%p2540_p11), 224, %s282_s20 }
  0x61   : > { %s2448_s12 = scalar_lea.vmem (!%p2540_p11), [#allocation3], %s1842_s21 }
  0x65   : > { %2222 = dma.done.wait (%p2541_p13), %s283_s25, 3584  }
  0x66   : > { %2224 = vsyncadd (%p2541_p13), %s283_s25, 4294963712  ;;  %p2542_p3 = scmp.ne.s32.totalorder %s2535_s30, 0 }
  0x68   : > { %2226 = dma.done.wait (%p2542_p3), [#allocation6], 16640  }
  0x69   : > { %2228 = vsyncadd (%p2542_p3), [#allocation6], 4294950656  ;;  %v1908_v0 = vld [vmem:[#allocation5 + $0x104] ss:$8 sps:$4 sm:$0xff]   ;;  %v1910_v1 = vld [vmem:[#allocation5 + $0x100] ss:$8 sps:$4 sm:$0xff]  }
  0x6a   : > { %1035 = vmatprep.subr.bf16.mxu0 %v1908_v0  ;;  %v1911_v2 = vld [vmem:[#allocation5 + $0x114] ss:$8 sps:$4 sm:$0xff]   ;;  %v1913_v3 = vld [vmem:[#allocation5 + $0x110] ss:$8 sps:$4 sm:$0xff]   ;;  %v1914_v4 = vld [vmem:[#allocation5 + $0x124] ss:$8 sps:$4 sm:$0xff]  }
  0x6b   : > { %1036 = vmatpush1.bf16.msra.mxu0 %v1910_v1  ;;  %v1916_v5 = vld [vmem:[#allocation5 + $0x120] ss:$8 sps:$4 sm:$0xff]   ;;  %v1917_v6 = vld [vmem:[#allocation5 + $0x134] ss:$8 sps:$4 sm:$0xff]   ;;  %v1919_v7 = vld [vmem:[#allocation5 + $0x130] ss:$8 sps:$4 sm:$0xff]  }
  0x6c   : > { %1037 = vmatprep.subr.bf16.mxu0 %v1911_v2  ;;  %v1920_v8 = vld [vmem:[#allocation5 + $0x144] ss:$8 sps:$4 sm:$0xff]   ;;  %v1922_v9 = vld [vmem:[#allocation5 + $0x140] ss:$8 sps:$4 sm:$0xff]   ;;  %v1923_v10 = vld [vmem:[#allocation5 + $0x154] ss:$8 sps:$4 sm:$0xff]  }
  0x6d   : > { %v1925_v11 = vld [vmem:[#allocation5 + $0x150] ss:$8 sps:$4 sm:$0xff]   ;;  %v1926_v12 = vld [vmem:[#allocation5 + $0x164] ss:$8 sps:$4 sm:$0xff]   ;;  %v1928_v16 = vld [vmem:[#allocation5 + $0x160] ss:$8 sps:$4 sm:$0xff]  }
  0x6e   : > { %v336_v13 = vld [vmem:[%s2448_s12 + $0x18] sm:$0xff]  ;;  %v343_v14 = vld [vmem:[%s2448_s12 + $0x50] sm:$0xff]  ;;  %v1965_v19 = vld [vmem:[#allocation5 + $0x4] ss:$8 sps:$4 sm:$0xff]   ;;  %vm975_vm0 = vcmask 130048   ;;  %s1535_s19 = sld [smem:[#allocation2]] }
  0x6f   : > { %1038 = vmatpush1.bf16.msra.mxu0 %v1913_v3  ;;  %v364_v15 = vpack.c.bf16 %v343_v14, %v336_v13  ;;  %v1929_v17 = vld [vmem:[#allocation5 + $0x174] ss:$8 sps:$4 sm:$0xff]   ;;  %v1931_v18 = vld [vmem:[#allocation5 + $0x170] ss:$8 sps:$4 sm:$0xff]   ;;  %v1932_v20 = vld [vmem:[#allocation5 + $0x184] ss:$8 sps:$4 sm:$0xff]   ;;  %982 = vmatprep.subr.bf16.mxu1 %v1965_v19 }
  0x70   : > { %1039 = vmatprep.subr.bf16.mxu0 %v1914_v4  ;;  %v1970_v21 = vld [vmem:[#allocation5] ss:$8 sps:$4 sm:$0xff]   ;;  %v1971_v22 = vld [vmem:[#allocation5 + $0x14] ss:$8 sps:$4 sm:$0xff]   ;;  %v1976_v25 = vld [vmem:[#allocation5 + $0x10] ss:$8 sps:$4 sm:$0xff]  }
  0x71   : > { %1067 = vmatprep.mubr.bf16.mxu0 %v364_v15  ;;  %v1934_v23 = vld [vmem:[#allocation5 + $0x180] ss:$8 sps:$4 sm:$0xff]   ;;  %v1935_v24 = vld [vmem:[#allocation5 + $0x194] ss:$8 sps:$4 sm:$0xff]   ;;  %983 = vmatpush1.bf16.msra.mxu1 %v1970_v21  ;;  %v1977_v26 = vld [vmem:[#allocation5 + $0x24] ss:$8 sps:$4 sm:$0xff]  }
  0x72   : > { %984 = vmatprep.subr.bf16.mxu1 %v1971_v22  ;;  %v1937_v27 = vld [vmem:[#allocation5 + $0x190] ss:$8 sps:$4 sm:$0xff]   ;;  %v1982_v28 = vld [vmem:[#allocation5 + $0x20] ss:$8 sps:$4 sm:$0xff]   ;;  %v1938_v29 = vld [vmem:[#allocation5 + $0x1a4] ss:$8 sps:$4 sm:$0xff]  }
  0x73   : > { %1040 = vmatpush1.bf16.msra.mxu0 %v1916_v5  ;;  %v1983_v30 = vld [vmem:[#allocation5 + $0x34] ss:$8 sps:$4 sm:$0xff]   ;;  %v1940_v31 = vld [vmem:[#allocation5 + $0x1a0] ss:$8 sps:$4 sm:$0xff]   ;;  %v1988_v33 = vld [vmem:[#allocation5 + $0x30] ss:$8 sps:$4 sm:$0xff]  }
  0x74   : > { %1041 = vmatprep.subr.bf16.mxu0 %v1917_v6  ;;  %v1941_v32 = vld [vmem:[#allocation5 + $0x1b4] ss:$8 sps:$4 sm:$0xff]   ;;  %v1989_v34 = vld [vmem:[#allocation5 + $0x44] ss:$8 sps:$4 sm:$0xff]   ;;  %v1943_v35 = vld [vmem:[#allocation5 + $0x1b0] ss:$8 sps:$4 sm:$0xff]  }
  0x75   : > { %985 = vmatpush1.bf16.msra.mxu1 %v1976_v25  ;;  %v1994_v36 = vld [vmem:[#allocation5 + $0x40] ss:$8 sps:$4 sm:$0xff]   ;;  %v1944_v37 = vld [vmem:[#allocation5 + $0x1c4] ss:$8 sps:$4 sm:$0xff]   ;;  %v1995_v38 = vld [vmem:[#allocation5 + $0x54] ss:$8 sps:$4 sm:$0xff]  }
  0x76   : > { %986 = vmatprep.subr.bf16.mxu1 %v1977_v26  ;;  %v1946_v39 = vld [vmem:[#allocation5 + $0x1c0] ss:$8 sps:$4 sm:$0xff]   ;;  %v1947_v40 = vld [vmem:[#allocation5 + $0x1d4] ss:$8 sps:$4 sm:$0xff]   ;;  %v2000_v41 = vld [vmem:[#allocation5 + $0x50] ss:$8 sps:$4 sm:$0xff]  }
  0x77   : > { %1042 = vmatpush1.bf16.msra.mxu0 %v1919_v7  ;;  %v2001_v42 = vld [vmem:[#allocation5 + $0x64] ss:$8 sps:$4 sm:$0xff]   ;;  %v1949_v43 = vld [vmem:[#allocation5 + $0x1d0] ss:$8 sps:$4 sm:$0xff]   ;;  %v2006_v44 = vld [vmem:[#allocation5 + $0x60] ss:$8 sps:$4 sm:$0xff]  }
  0x78   : > { %1043 = vmatprep.subr.bf16.mxu0 %v1920_v8  ;;  %v1950_v45 = vld [vmem:[#allocation5 + $0x1e4] ss:$8 sps:$4 sm:$0xff]   ;;  %v2007_v46 = vld [vmem:[#allocation5 + $0x74] ss:$8 sps:$4 sm:$0xff]   ;;  %v1952_v47 = vld [vmem:[#allocation5 + $0x1e0] ss:$8 sps:$4 sm:$0xff]  }
  0x79   : > { %987 = vmatpush1.bf16.msra.mxu1 %v1982_v28  ;;  %v2012_v48 = vld [vmem:[#allocation5 + $0x70] ss:$8 sps:$4 sm:$0xff]   ;;  %v1953_v49 = vld [vmem:[#allocation5 + $0x1f4] ss:$8 sps:$4 sm:$0xff]   ;;  %v2013_v50 = vld [vmem:[#allocation5 + $0x84] ss:$8 sps:$4 sm:$0xff]  }
  0x7a   : > { %988 = vmatprep.subr.bf16.mxu1 %v1983_v30  ;;  %v1955_v51 = vld [vmem:[#allocation5 + $0x1f0] ss:$8 sps:$4 sm:$0xff]   ;;  %v1958_v52 = vld [vmem:[#allocation5 + $0x204] ss:$8 sps:$4 sm:$0xff]   ;;  %v2018_v55 = vld [vmem:[#allocation5 + $0x80] ss:$8 sps:$4 sm:$0xff]  }
  0x7b   : > { %1044 = vmatpush1.bf16.msra.mxu0 %v1922_v9  ;;  %v335_v53 = vld [vmem:[%s2448_s12 + $0x10] sm:$0xff]  ;;  %v342_v54 = vld [vmem:[%s2448_s12 + $0x48] sm:$0xff]  ;;  %v357_v60 = vld [vmem:[%s2448_s12 + $0xc0] sm:$0xff]  ;;  %s1668_s15 = sshll.u32 %s1656_s6, 2 }
  0x7c   : > { %1045 = vmatprep.subr.bf16.mxu0 %v1923_v10  ;;  %v2019_v56 = vld [vmem:[#allocation5 + $0x94] ss:$8 sps:$4 sm:$0xff]   ;;  %v1956_v57 = vld [vmem:[#allocation5 + $0x200] ss:$8 sps:$4 sm:$0xff]   ;;  %v363_v58 = vpack.c.bf16 %v342_v54, %v335_v53  ;;  %v2024_v61 = vld [vmem:[#allocation5 + $0x90] ss:$8 sps:$4 sm:$0xff]  }
  0x7d   : > { %989 = vmatpush1.bf16.msra.mxu1 %v1988_v33  ;;  %v350_v59 = vld [vmem:[%s2448_s12 + $0x88] sm:$0xff]  ;;  %v1961_v62 = vld [vmem:[#allocation5 + $0x214] ss:$8 sps:$4 sm:$0xff]   ;;  %v1959_v1 = vld [vmem:[#allocation5 + $0x210] ss:$8 sps:$4 sm:$0xff]   ;;  %p327_p10 = scmp.lt.s32.totalorder %s1668_s15, 7 }
  0x7e   : > { %990 = vmatprep.subr.bf16.mxu1 %v1989_v34  ;;  %v2025_v63 = vld [vmem:[#allocation5 + $0xa4] ss:$8 sps:$4 sm:$0xff]   ;;  %v371_v0 = vpack.c.bf16 %v357_v60, %v350_v59  ;;  %v2030_v2 = vld [vmem:[#allocation5 + $0xa0] ss:$8 sps:$4 sm:$0xff]   ;;  %v356_v4 = vld [vmem:[%s2448_s12 + $0xb8] sm:$0xff] }
  0x7f   : > { %1046 = vmatpush1.bf16.msra.mxu0 %v1925_v11  ;;  %v349_v3 = vld [vmem:[%s2448_s12 + $0x80] sm:$0xff]  ;;  %v2031_v6 = vld [vmem:[#allocation5 + $0xb4] ss:$8 sps:$4 sm:$0xff]   ;;  %v338_v8 = vld [vmem:[%s2448_s12 + $0x28] sm:$0xff]  ;;  %s2548_s15 = smov (!%p327_p10, %s1668_s15), 7 }
  0x80   : > { %1047 = vmatprep.subr.bf16.mxu0 %v1926_v12  ;;  %v1964_v5 = vld [vmem:[#allocation5 + $0x224] ss:$8 sps:$4 sm:$0xff]   ;;  %v370_v7 = vpack.c.bf16 %v356_v4, %v349_v3  ;;  %v1962_v11 = vld [vmem:[#allocation5 + $0x220] ss:$8 sps:$4 sm:$0xff]   ;;  %v2036_v12 = vld [vmem:[#allocation5 + $0xb0] ss:$8 sps:$4 sm:$0xff]  }
  0x81   : > { %991 = vmatpush1.bf16.msra.mxu1 %v1994_v36  ;;  %v345_v9 = vld [vmem:[%s2448_s12 + $0x60] sm:$0xff]  ;;  %v334_v10 = vld [vmem:[%s2448_s12 + $0x8] sm:$0xff]  ;;  %v1969_v14 = vld [vmem:[#allocation5 + $0x234] ss:$8 sps:$4 sm:$0xff]   ;;  %s1669_s26 = sshll.u32 %s2548_s15, 3 }
  0x82   : > { %992 = vmatprep.subr.bf16.mxu1 %v1995_v38  ;;  %v341_v13 = vld [vmem:[%s2448_s12 + $0x40] sm:$0xff]  ;;  %v2043_v21 = vld [vmem:[#allocation5 + $0xd4] ss:$8 sps:$4 sm:$0xff]   ;;  %v1979_v26 = vld [vmem:[#allocation5 + $0x250] ss:$8 sps:$4 sm:$0xff]   ;;  %s330_s29 = scalar_lea.vmem %s2530_s7, %s1669_s26 }
  0x83   : > { %1048 = vmatpush1.bf16.msra.mxu0 %v1928_v16  ;;  %v2037_v15 = vld [vmem:[#allocation5 + $0xc4] ss:$8 sps:$4 sm:$0xff]   ;;  %v362_v16 = vpack.c.bf16 %v341_v13, %v334_v10  ;;  %v1973_v22 = vld [vmem:[#allocation5 + $0x240] ss:$8 sps:$4 sm:$0xff]   ;;  %v340_v34 = vld [vmem:[%s2448_s12 + $0x38] sm:$0xff] }
  0x84   : > { %1049 = vmatprep.subr.bf16.mxu0 %v1929_v17  ;;  %v366_v17 = vpack.c.bf16 %v345_v9, %v338_v8  ;;  %v1975_v19 = vld [vmem:[#allocation5 + $0x244] ss:$8 sps:$4 sm:$0xff]   ;;  %v2051_v28 = vld [vmem:[#allocation5 + $0xe0] ss:$8 sps:$4 sm:$0xff]   ;;  %v355_v36 = vld [vmem:[%s2448_s12 + $0xb0] sm:$0xff] }
  0x85   : > { %993 = vmatpush1.bf16.msra.mxu1 %v2000_v41  ;;  %1014 = vmatprep.mubr.bf16.mxu1 %v362_v16  ;;  %v2049_v25 = vld [vmem:[#allocation5 + $0xe4] ss:$8 sps:$4 sm:$0xff]   ;;  %v1985_v30 = vld [vmem:[#allocation5 + $0x260] ss:$8 sps:$4 sm:$0xff]   ;;  %v1991_v38 = vld [vmem:[#allocation5 + $0x270] ss:$8 sps:$4 sm:$0xff]  }
  0x86   : > { %994 = vmatprep.subr.bf16.mxu1 %v2001_v42  ;;  %v333_v33 = vld [vmem:[%s2448_s12] sm:$0xff]  ;;  %v2055_v41 = vld [vmem:[#allocation7] ss:$8 sps:$4 sm:$0xff]   ;;  %v2041_v8 = vld [vmem:[#allocation5 + $0x2f4] ss:$8 sps:$4 sm:$0xff]  }
  0x87   : > { %1050 = vmatpush1.bf16.msra.mxu0 %v1931_v18  ;;  %v1967_v18 = vld [vmem:[#allocation5 + $0x230] ss:$8 sps:$4 sm:$0xff]   ;;  %v2066_v54 = vld [vmem:[#allocation7 + $0x34] ss:$8 sps:$4 sm:$0xff]   ;;  %v2076_v9 = vld [vmem:[#allocation7 + $0x70] ss:$8 sps:$4 sm:$0xff]  }
  0x88   : > { %1051 = vmatprep.subr.bf16.mxu0 %v1932_v20  ;;  %v2042_v20 = vld [vmem:[#allocation5 + $0xc0] ss:$8 sps:$4 sm:$0xff]   ;;  %v2061_v53 = vld [vmem:[#allocation7 + $0x20] ss:$8 sps:$4 sm:$0xff]   ;;  %v2023_v60 = vld [vmem:[#allocation5 + $0x2c4] ss:$8 sps:$4 sm:$0xff]  }
  0x89   : > { %995 = vmatpush1.bf16.msra.mxu1 %v2006_v44  ;;  %v1997_v44 = vld [vmem:[#allocation5 + $0x280] ss:$8 sps:$4 sm:$0xff]   ;;  %v2015_v59 = vld [vmem:[#allocation5 + $0x2b0] ss:$8 sps:$4 sm:$0xff]   ;;  %v2035_v4 = vld [vmem:[#allocation5 + $0x2e4] ss:$8 sps:$4 sm:$0xff]  }
  0x8a   : > { %996 = vmatprep.subr.bf16.mxu1 %v2007_v46  ;;  %v354_v46 = vld [vmem:[%s2448_s12 + $0xa8] sm:$0xff]  ;;  %v2027_v3 = vld [vmem:[#allocation5 + $0x2d0] ss:$8 sps:$4 sm:$0xff]   ;;  %v2081_v10 = vld [vmem:[#allocation7 + $0x84] ss:$8 sps:$4 sm:$0xff]  }
  0x8b   : > { %1052 = vmatpush1.bf16.msra.mxu0 %v1934_v23  ;;  %v1981_v23 = vld [vmem:[#allocation5 + $0x254] ss:$8 sps:$4 sm:$0xff]  }
  0x8c   : > { %1053 = vmatprep.subr.bf16.mxu0 %v1935_v24  ;;  %v2048_v24 = vld [vmem:[#allocation5 + $0xd0] ss:$8 sps:$4 sm:$0xff]  }
  0x8d   : > { %997 = vmatpush1.bf16.msra.mxu1 %v2012_v48  ;;  %v2058_v48 = vld [vmem:[#allocation7 + $0x10] ss:$8 sps:$4 sm:$0xff]   ;;  %v344_v13 = vld [vmem:[%s2448_s12 + $0x58] sm:$0xff]  ;;  %v359_v16 = vld [vmem:[%s2448_s12 + $0xd0] sm:$0xff] }
  0x8e   : > { %998 = vmatprep.subr.bf16.mxu1 %v2013_v50 }
  0x8f   : > { %1054 = vmatpush1.bf16.msra.mxu0 %v1937_v27  ;;  %v1987_v27 = vld [vmem:[#allocation5 + $0x264] ss:$8 sps:$4 sm:$0xff]  }
  0x90   : > { %1055 = vmatprep.subr.bf16.mxu0 %v1938_v29  ;;  %v2052_v29 = vld [vmem:[#allocation5 + $0xf4] ss:$8 sps:$4 sm:$0xff]  }
  0x91   : > { %999 = vmatpush1.bf16.msra.mxu1 %v2018_v55  ;;  %v2009_v55 = vld [vmem:[#allocation5 + $0x2a0] ss:$8 sps:$4 sm:$0xff]  }
  0x92   : > { %1000 = vmatprep.subr.bf16.mxu1 %v2019_v56  ;;  %v2017_v56 = vld [vmem:[#allocation5 + $0x2b4] ss:$8 sps:$4 sm:$0xff]  }
  0x93   : > { %1056 = vmatpush1.bf16.msra.mxu0 %v1940_v31  ;;  %v2054_v31 = vld [vmem:[#allocation5 + $0xf0] ss:$8 sps:$4 sm:$0xff]  }
  0x94   : > { %1057 = vmatprep.subr.bf16.mxu0 %v1941_v32  ;;  %v1993_v32 = vld [vmem:[#allocation5 + $0x274] ss:$8 sps:$4 sm:$0xff]  }
  0x95   : > { %1001 = vmatpush1.bf16.msra.mxu1 %v2024_v61  ;;  %v2067_v61 = vld [vmem:[#allocation7 + $0x40] ss:$8 sps:$4 sm:$0xff]  }
  0x96   : > { %1002 = vmatprep.subr.bf16.mxu1 %v2025_v63  ;;  %v2021_v63 = vld [vmem:[#allocation5 + $0x2c0] ss:$8 sps:$4 sm:$0xff]  }
  0x97   : > { %1058 = vmatpush1.bf16.msra.mxu0 %v1943_v35  ;;  %v348_v35 = vld [vmem:[%s2448_s12 + $0x78] sm:$0xff] }
  0x98   : > { %1059 = vmatprep.subr.bf16.mxu0 %v1944_v37  ;;  %v2057_v37 = vld [vmem:[#allocation7 + $0x4] ss:$8 sps:$4 sm:$0xff]   ;;  %v369_v42 = vpack.c.bf16 %v355_v36, %v348_v35 }
  0x99   : > { %1003 = vmatpush1.bf16.msra.mxu1 %v2030_v2  ;;  %v2075_v2 = vld [vmem:[#allocation7 + $0x64] ss:$8 sps:$4 sm:$0xff]  }
  0x9a   : > { %1004 = vmatprep.subr.bf16.mxu1 %v2031_v6  ;;  %v2078_v6 = vld [vmem:[#allocation7 + $0x74] ss:$8 sps:$4 sm:$0xff]   ;;  %v360_v35 = vld [vmem:[%s2448_s12 + $0xd8] sm:$0xff] }
  0x9b   : > { %1060 = vmatpush1.bf16.msra.mxu0 %v1946_v39  ;;  %v1999_v39 = vld [vmem:[#allocation5 + $0x284] ss:$8 sps:$4 sm:$0xff]  }
  0x9c   : > { %1061 = vmatprep.subr.bf16.mxu0 %v1947_v40  ;;  %v361_v40 = vpack.c.bf16 %v340_v34, %v333_v33  ;;  %v353_v34 = vld [vmem:[%s2448_s12 + $0xa0] sm:$0xff] }
  0x9d   : > { %1005 = vmatpush1.bf16.msra.mxu1 %v2036_v12  ;;  %v337_v12 = vld [vmem:[%s2448_s12 + $0x20] sm:$0xff]  ;;  %v374_v36 = vpack.c.bf16 %v360_v35, %v353_v34 }
  0x9e   : > { %1006 = vmatprep.subr.bf16.mxu1 %v2037_v15  ;;  %v352_v15 = vld [vmem:[%s2448_s12 + $0x98] sm:$0xff] }
  0x9f   : > { %1062 = vmatpush1.bf16.msra.mxu0 %v1949_v43  ;;  %v2060_v43 = vld [vmem:[#allocation7 + $0x14] ss:$8 sps:$4 sm:$0xff]  }
  0xa0   : > { %1063 = vmatprep.subr.bf16.mxu0 %v1950_v45  ;;  %v347_v45 = vld [vmem:[%s2448_s12 + $0x70] sm:$0xff] }
  0xa1   : > { %1007 = vmatpush1.bf16.msra.mxu1 %v2042_v20  ;;  %v368_v50 = vpack.c.bf16 %v354_v46, %v347_v45  ;;  %v2045_v20 = vld [vmem:[#allocation5 + $0x300] ss:$8 sps:$4 sm:$0xff]  }
  0xa2   : > { %1008 = vmatprep.subr.bf16.mxu1 %v2043_v21  ;;  %v373_v21 = vpack.c.bf16 %v359_v16, %v352_v15 }
  0xa3   : > { %1064 = vmatpush1.bf16.msra.mxu0 %v1952_v47  ;;  %v2005_v47 = vld [vmem:[#allocation5 + $0x294] ss:$8 sps:$4 sm:$0xff]  }
  0xa4   : > { %1065 = vmatprep.subr.bf16.mxu0 %v1953_v49  ;;  %v2063_v49 = vld [vmem:[#allocation7 + $0x24] ss:$8 sps:$4 sm:$0xff]  }
  0xa5   : > { %1009 = vmatpush1.bf16.msra.mxu1 %v2048_v24  ;;  %v351_v24 = vld [vmem:[%s2448_s12 + $0x90] sm:$0xff] }
  0xa6   : > { %1010 = vmatprep.subr.bf16.mxu1 %v2049_v25  ;;  %v358_v25 = vld [vmem:[%s2448_s12 + $0xc8] sm:$0xff] }
  0xa7   : > { %1066 = vmatpush1.bf16.msra.mxu0 %v1955_v51  ;;  %v2003_v51 = vld [vmem:[#allocation5 + $0x290] ss:$8 sps:$4 sm:$0xff]  }
  0xa8   : > { %1088 = vmatprep.subr.bf16.mxu0 %v1958_v52  ;;  %v2011_v52 = vld [vmem:[#allocation5 + $0x2a4] ss:$8 sps:$4 sm:$0xff]  }
  0xa9   : > { %1011 = vmatpush1.bf16.msra.mxu1 %v2051_v28  ;;  %v372_v28 = vpack.c.bf16 %v358_v25, %v351_v24 }
  0xaa   : > { %1068 = vmatmul.mubr.bf16.vlgmr.msra.gmra.mrb[0].mxu0 %v363_v58  ;;  %1012 = vmatprep.subr.bf16.mxu1 %v2052_v29  ;;  %v2069_v58 = vld [vmem:[#allocation7 + $0x44] ss:$8 sps:$4 sm:$0xff]   ;;  %v2088_v29 = vld [vmem:[#allocation7 + $0xb0] ss:$8 sps:$4 sm:$0xff]  }
  0xab   : > { %1089 = vmatpush1.bf16.msra.mxu0 %v1956_v57  ;;  %1077 = vmatprep.mubr.bf16.mxu0 %v371_v0  ;;  %v2064_v57 = vld [vmem:[#allocation7 + $0x30] ss:$8 sps:$4 sm:$0xff]   ;;  %v2029_v0 = vld [vmem:[#allocation5 + $0x2d4] ss:$8 sps:$4 sm:$0xff]  }
  0xac   : > { %1090 = vmatprep.subr.bf16.mxu0 %v1961_v62  ;;  %v2072_v62 = vld [vmem:[#allocation7 + $0x54] ss:$8 sps:$4 sm:$0xff]  }
  0xad   : > { %1013 = vmatpush1.bf16.msra.mxu1 %v2054_v31  ;;  %v339_v31 = vld [vmem:[%s2448_s12 + $0x30] sm:$0xff] }
  0xae   : > { %1426 = vmatprep.subr.bf16.mxu1 %v2057_v37  ;;  %v2091_v37 = vld [vmem:[#allocation7 + $0xc0] ss:$8 sps:$4 sm:$0xff]  }
  0xaf   : > { %1091 = vmatpush1.bf16.msra.mxu0 %v1959_v1  ;;  %v2070_v1 = vld [vmem:[#allocation7 + $0x50] ss:$8 sps:$4 sm:$0xff]  }
  0xb0   : > { %1092 = vmatprep.subr.bf16.mxu0 %v1964_v5  ;;  %1015 = vmatmul.mubr.bf16.vlgmr.msra.gmra.mrb[0].mxu1 %v361_v40  ;;  %v2073_v5 = vld [vmem:[#allocation7 + $0x60] ss:$8 sps:$4 sm:$0xff]   ;;  %v2094_v40 = vld [vmem:[#allocation7 + $0xd0] ss:$8 sps:$4 sm:$0xff]  }
  0xb1   : > { %1024 = vmatprep.mubr.bf16.mxu1 %v369_v42  ;;  %1427 = vmatpush1.bf16.msra.mxu1 %v2055_v41  ;;  %v2099_v41 = vld [vmem:[#allocation7 + $0xe4] ss:$8 sps:$4 sm:$0xff]   ;;  %v2097_v42 = vld [vmem:[#allocation7 + $0xe0] ss:$8 sps:$4 sm:$0xff]  }
  0xb2   : > { %1078 = vmatmul.mubr.bf16.gmra.mrb[4].mxu0 %v370_v7  ;;  %1428 = vmatprep.subr.bf16.mxu1 %v2060_v43  ;;  %v2033_v7 = vld [vmem:[#allocation5 + $0x2e0] ss:$8 sps:$4 sm:$0xff]   ;;  %v2102_v43 = vld [vmem:[#allocation7 + $0xf4] ss:$8 sps:$4 sm:$0xff]  }
  0xb3   : > { %1093 = vmatpush1.bf16.msra.mxu0 %v1962_v11  ;;  %1120 = vmatprep.mubr.bf16.mxu0 %v366_v17  ;;  %v2039_v11 = vld [vmem:[#allocation5 + $0x2f0] ss:$8 sps:$4 sm:$0xff]  }
  0xb4   : > { %1094 = vmatprep.subr.bf16.mxu0 %v1969_v14  ;;  %v2047_v14 = vld [vmem:[#allocation5 + $0x304] ss:$8 sps:$4 sm:$0xff]   ;;  %v2079_v17 = vld [vmem:[#allocation7 + $0x80] ss:$8 sps:$4 sm:$0xff]  }
  0xb5   : > { %1429 = vmatpush1.bf16.msra.mxu1 %v2058_v48 }
  0xb6   : > { %1430 = vmatprep.subr.bf16.mxu1 %v2063_v49 }
  0xb7   : > { %1095 = vmatpush1.bf16.msra.mxu0 %v1967_v18  ;;  %v2084_v18 = vld [vmem:[#allocation7 + $0x94] ss:$8 sps:$4 sm:$0xff]  }
  0xb8   : > { %1096 = vmatprep.subr.bf16.mxu0 %v1975_v19  ;;  %1025 = vmatmul.mubr.bf16.gmra.mrb[4].mxu1 %v368_v50  ;;  %v365_v19 = vpack.c.bf16 %v344_v13, %v337_v12 }
  0xb9   : > { %1431 = vmatpush1.bf16.msra.mxu1 %v2061_v53  ;;  %v475_v53 = vlaneseq }
  0xba   : > { %1432 = vmatprep.subr.bf16.mxu1 %v2066_v54 }
  0xbb   : > { %1097 = vmatpush1.bf16.msra.mxu0 %v1973_v22  ;;  %v2082_v22 = vld [vmem:[#allocation7 + $0x90] ss:$8 sps:$4 sm:$0xff]   ;;  %v476_v54 = vshrl.u32 %v475_v53, 7 }
  0xbc   : > { %1098 = vmatprep.subr.bf16.mxu0 %v1981_v23  ;;  %v2087_v23 = vld [vmem:[#allocation7 + $0xa4] ss:$8 sps:$4 sm:$0xff]  }
  0xbd   : > { %1433 = vmatpush1.bf16.msra.mxu1 %v2064_v57  ;;  %v2491_v57 = vsub.s32 1, %v476_v54 }
  0xbe   : > { %1434 = vmatprep.subr.bf16.mxu1 %v2069_v58 }
  0xbf   : > { %1099 = vmatpush1.bf16.msra.mxu0 %v1979_v26  ;;  %v2085_v26 = vld [vmem:[#allocation7 + $0xa0] ss:$8 sps:$4 sm:$0xff]  }
  0xc0   : > { %1100 = vmatprep.subr.bf16.mxu0 %v1987_v27  ;;  %v2090_v27 = vld [vmem:[#allocation7 + $0xb4] ss:$8 sps:$4 sm:$0xff]  }
  0xc1   : > { %1435 = vmatpush1.bf16.msra.mxu1 %v2067_v61 }
  0xc2   : > { %1436 = vmatprep.subr.bf16.mxu1 %v2072_v62 }
  0xc3   : > { %1101 = vmatpush1.bf16.msra.mxu0 %v1985_v30  ;;  %v2252_v30 = vmov 0  }
  0xc4   : > { %1102 = vmatprep.subr.bf16.mxu0 %v1993_v32  ;;  %v346_v32 = vld [vmem:[%s2448_s12 + $0x68] sm:$0xff] }
  0xc5   : > { %1437 = vmatpush1.bf16.msra.mxu1 %v2070_v1  ;;  %v367_v33 = vpack.c.bf16 %v346_v32, %v339_v31 }
  0xc6   : > { %1438 = vmatprep.subr.bf16.mxu1 %v2075_v2 }
  0xc7   : > { %1103 = vmatpush1.bf16.msra.mxu0 %v1991_v38  ;;  %v2093_v38 = vld [vmem:[#allocation7 + $0xc4] ss:$8 sps:$4 sm:$0xff]  }
  0xc8   : > { %1104 = vmatprep.subr.bf16.mxu0 %v1999_v39  ;;  %v2096_v39 = vld [vmem:[#allocation7 + $0xd4] ss:$8 sps:$4 sm:$0xff]  }
  0xc9   : > { %1439 = vmatpush1.bf16.msra.mxu1 %v2073_v5 }
  0xca   : > { %1440 = vmatprep.subr.bf16.mxu1 %v2078_v6 }
  0xcb   : > { %1105 = vmatpush1.bf16.msra.mxu0 %v1997_v44  ;;  %v2100_v44 = vld [vmem:[#allocation7 + $0xf0] ss:$8 sps:$4 sm:$0xff]  }
  0xcc   : > { %1106 = vmatprep.subr.bf16.mxu0 %v2005_v47 }
  0xcd   : > { %1441 = vmatpush1.bf16.msra.mxu1 %v2076_v9 }
  0xce   : > { %1442 = vmatprep.subr.bf16.mxu1 %v2081_v10 }
  0xcf   : > { %1107 = vmatpush1.bf16.msra.mxu0 %v2003_v51 }
  0xd0   : > { %1108 = vmatprep.subr.bf16.mxu0 %v2011_v52 }
  0xd1   : > { %1443 = vmatpush1.bf16.msra.mxu1 %v2079_v17 }
  0xd2   : > { %1444 = vmatprep.subr.bf16.mxu1 %v2084_v18 }
  0xd3   : > { %1109 = vmatpush1.bf16.msra.mxu0 %v2009_v55  ;;  %v2486_v55 = vsub.s32 0, %v476_v54 }
  0xd4   : > { %1110 = vmatprep.subr.bf16.mxu0 %v2017_v56  ;;  %v473_v56 = vld [vmem:[%s2525_s2] sm:$0x3] }
  0xd5   : > { %1445 = vmatpush1.bf16.msra.mxu1 %v2082_v22  ;;  %v478_v58 = vrot.slane %v473_v56, %v2486_v55 }
  0xd6   : > { %1446 = vmatprep.subr.bf16.mxu1 %v2087_v23 }
  0xd7   : > { %1111 = vmatpush1.bf16.msra.mxu0 %v2015_v59  ;;  %v482_v59 = vrot.slane %v473_v56, %v2491_v57 }
  0xd8   : > { %1112 = vmatprep.subr.bf16.mxu0 %v2023_v60 }
  0xd9   : > { %1447 = vmatpush1.bf16.msra.mxu1 %v2085_v26 }
  0xda   : > { %1448 = vmatprep.subr.bf16.mxu1 %v2090_v27 }
  0xdb   : > { %1113 = vmatpush1.bf16.msra.mxu0 %v2021_v63 }
  0xdc   : > { %1114 = vmatprep.subr.bf16.mxu0 %v2029_v0 }
  0xdd   : > { %1449 = vmatpush1.bf16.msra.mxu1 %v2088_v29 }
  0xde   : > { %1450 = vmatprep.subr.bf16.mxu1 %v2093_v38 }
  0xdf   : > { %1115 = vmatpush1.bf16.msra.mxu0 %v2027_v3 }
  0xe0   : > { %1116 = vmatprep.subr.bf16.mxu0 %v2035_v4 }
  0xe1   : > { %1451 = vmatpush1.bf16.msra.mxu1 %v2091_v37 }
  0xe2   : > { %1452 = vmatprep.subr.bf16.mxu1 %v2096_v39 }
  0xe3   : > { %1117 = vmatpush1.bf16.msra.mxu0 %v2033_v7 }
  0xe4   : > { %1118 = vmatprep.subr.bf16.mxu0 %v2041_v8 }
  0xe5   : > { %1453 = vmatpush1.bf16.msra.mxu1 %v2094_v40  ;;  %v1254_v40 = vld [vmem:[%s2527_s4] sm:$0x3] }
  0xe6   : > { %1454 = vmatprep.subr.bf16.mxu1 %v2099_v41  ;;  %v1259_v41 = vrot.slane %v1254_v40, %v2486_v55 }
  0xe7   : > { %1119 = vmatpush1.bf16.msra.mxu0 %v2039_v11 }
  0xe8   : > { %1141 = vmatprep.subr.bf16.mxu0 %v2047_v14 }
  0xe9   : > { %1455 = vmatpush1.bf16.msra.mxu1 %v2097_v42  ;;  %v1263_v42 = vrot.slane %v1254_v40, %v2491_v57 }
  0xea   : > { %1121 = vmatmul.mubr.bf16.vlgmr.msra.gmra.mrb[0].mxu0 %v365_v19  ;;  %1456 = vmatprep.subr.bf16.mxu1 %v2102_v43  ;;  %v1503_v43 = vld [vmem:[%s2528_s5] sm:$0x3] }
  0xeb   : > { %1142 = vmatpush1.bf16.msra.mxu0 %v2045_v20  ;;  %1130 = vmatprep.mubr.bf16.mxu0 %v373_v21  ;;  %v1512_v53 = vrot.slane %v1503_v43, %v2491_v57 }
  0xed   : > { %1457 = vmatpush1.bf16.msra.mxu1 %v2100_v44 }
  0xf2   : > { %1131 = vmatmul.mubr.bf16.gmra.mrb[4].mxu0 %v372_v28 }
  0xf3   : > { %1173 = vmatprep.mubr.bf16.mxu0 %v2252_v30 }
  0xfa   : > { %1768 = vmatmul.mubr.msk.bf16.vlgmr.msra.gmra.mrb[0].mxu0 %vm975_vm0, %v367_v33 }
  0xfb   : > { %1183 = vmatprep.mubr.bf16.mxu0 %v2252_v30 }
 0x102   : > { %1769 = vmatmul.mubr.msk.bf16.gmra.mrb[4].mxu0 %vm975_vm0, %v374_v36 }
 0x183   : > { %v1016_v45 = vpop.f32.mrb[0].mxu1 }
 0x184   : > { %v1018_v46 = vpop.f32.mrb[1].mxu1  ;;  %v1017_v60 = vadd.f32 %v1016_v45, %v478_v58 }
 0x185   : > { %v1020_v47 = vpop.f32.mrb[2].mxu1  ;;  %v1019_v61 = vadd.f32 %v1018_v46, %v482_v59 }
 0x186   : > { %v1022_v48 = vpop.f32.mrb[3].mxu1  ;;  %v1021_v63 = vadd.f32 %v1020_v47, %v478_v58 }
 0x187   : > { %v1023_v2 = vadd.f32 %v1022_v48, %v482_v59 }
 0x18b   : > { %v1026_v49 = vpop.f32.mrb[4].mxu1 }
 0x18c   : > { %v1028_v50 = vpop.f32.mrb[5].mxu1  ;;  %v1027_v11 = vadd.f32 %v1026_v49, %v478_v58  ;;  %v1508_v49 = vrot.slane %v1503_v43, %v2486_v55 }
 0x18d   : > { %v1030_v51 = vpop.f32.mrb[6].mxu1  ;;  %v1029_v13 = vadd.f32 %v1028_v50, %v482_v59 }
 0x18e   : > { %v1032_v52 = vpop.f32.mrb[7].mxu1  ;;  %v1031_v20 = vadd.f32 %v1030_v51, %v478_v58 }
 0x18f   : > { %v1033_v24 = vadd.f32 %v1032_v52, %v482_v59 }
 0x1cd   : > { %v1175_v62 = vpop.f32.mrb[0].mxu0 }
 0x1ce   : > { %v1809_v0 = vadd.f32 %v1175_v62, %v1017_v60  ;;  %v1177_v1 = vpop.f32.mrb[1].mxu0 }
 0x1cf   : > { %v1811_v3 = vadd.f32 %v1177_v1, %v1019_v61  ;;  %v1179_v4 = vpop.f32.mrb[2].mxu0 }
 0x1d0   : > { %v1202_v5 = vmul.f32 0.2, %v1809_v0  ;;  %v1813_v6 = vadd.f32 %v1179_v4, %v1021_v63  ;;  %v1181_v7 = vpop.f32.mrb[3].mxu0  ;;  %vm1194_vm1 = vcmp.gt.f32.partialorder %v1809_v0, 0.0 }
 0x1d1   : > { %v1203_v8 = vmul.f32 0.2, %v1811_v3  ;;  %v1815_v9 = vadd.f32 %v1181_v7, %v1023_v2  ;;  %vm1195_vm2 = vcmp.gt.f32.partialorder %v1811_v3, 0.0 }
 0x1d2   : > { %vm1196_vm3 = vcmp.gt.f32.partialorder %v1813_v6, 0.0  ;;  %v1204_v10 = vmul.f32 0.2, %v1813_v6  ;;  %v1210_v14 = vsel %vm1194_vm1, %v1809_v0, %v1202_v5  ;;  %vm1565_vm1 = vcmask 7168  }
 0x1d3   : > { %vm1197_vm4 = vcmp.gt.f32.partialorder %v1815_v9, 0.0  ;;  %v1205_v12 = vmul.f32 0.2, %v1815_v9  ;;  %v1211_v18 = vsel %vm1195_vm2, %v1811_v3, %v1203_v8 }
 0x1d4   : > { %v1212_v15 = vsel %vm1196_vm3, %v1813_v6, %v1204_v10 }
 0x1d5   : > { %v1218_v16 = vpack.c.bf16 %v1212_v15, %v1210_v14  ;;  %v1185_v17 = vpop.f32.mrb[4].mxu0  ;;  %v1213_v19 = vsel %vm1197_vm4, %v1815_v9, %v1205_v12 }
 0x1d6   : > { %v1817_v21 = vadd.f32 %v1185_v17, %v1027_v11  ;;  %v1187_v22 = vpop.f32.mrb[5].mxu0  ;;  %v1219_v23 = vpack.c.bf16 %v1213_v19, %v1211_v18 }
 0x1d7   : > { %v1819_v25 = vadd.f32 %v1187_v22, %v1029_v13  ;;  %v1189_v26 = vpop.f32.mrb[6].mxu0 }
 0x1d8   : > { %v1206_v27 = vmul.f32 0.2, %v1817_v21  ;;  %v1821_v28 = vadd.f32 %v1189_v26, %v1031_v20  ;;  %v1191_v29 = vpop.f32.mrb[7].mxu0  ;;  %1458 = vmatprep.mubr.bf16.mxu1 %v1219_v23  ;;  %vm1198_vm5 = vcmp.gt.f32.partialorder %v1817_v21, 0.0  ;;  %v1536_v26 = vstv %s1535_s19 }
 0x1d9   : > { %v1207_v30 = vmul.f32 0.2, %v1819_v25  ;;  %v1823_v31 = vadd.f32 %v1191_v29, %v1033_v24  ;;  %1459 = vmatmul.mubr.bf16.vlgmr.msra.gmra.mrb[8].mxu1 %v1218_v16  ;;  %vm1199_vm6 = vcmp.gt.f32.partialorder %v1819_v25, 0.0 }
 0x1da   : > { %vm1200_vm7 = vcmp.gt.f32.partialorder %v1821_v28, 0.0  ;;  %v1208_v32 = vmul.f32 0.2, %v1821_v28  ;;  %v1214_v34 = vsel %vm1198_vm5, %v1817_v21, %v1206_v27 }
 0x1db   : > { %vm1201_vm8 = vcmp.gt.f32.partialorder %v1823_v31, 0.0  ;;  %v1209_v33 = vmul.f32 0.2, %v1823_v31  ;;  %v1215_v36 = vsel %vm1199_vm6, %v1819_v25, %v1207_v30 }
 0x1dc   : > { %v1216_v35 = vsel %vm1200_vm7, %v1821_v28, %v1208_v32 }
 0x1dd   : > { %v1217_v37 = vsel %vm1201_vm8, %v1823_v31, %v1209_v33  ;;  %v1220_v38 = vpack.c.bf16 %v1216_v35, %v1214_v34 }
 0x1de   : > { %v1221_v39 = vpack.c.bf16 %v1217_v37, %v1215_v36 }
 0x1e0   : > { %1468 = vmatprep.mubr.bf16.mxu1 %v1221_v39 }
 0x1e1   : > { %1469 = vmatmul.mubr.bf16.gmra.mrb[12].mxu1 %v1220_v38 }
 0x2ac   : > { %v1460_v44 = vpop.f32.mrb[8].mxu1 }
 0x2ad   : > { %v1461_v45 = vadd.f32 %v1460_v44, %v1259_v41  ;;  %v1462_v46 = vpop.f32.mrb[9].mxu1 }
 0x2ae   : > { %v1463_v47 = vadd.f32 %v1462_v46, %v1263_v42  ;;  %v1464_v48 = vpop.f32.mrb[10].mxu1 }
 0x2af   : > { %vm1479_vm9 = vcmp.gt.f32.partialorder %v1461_v45, 0.0  ;;  %v1487_v50 = vmul.f32 0.2, %v1461_v45  ;;  %v1465_v51 = vadd.f32 %v1464_v48, %v1259_v41  ;;  %v1466_v52 = vpop.f32.mrb[11].mxu1 }
 0x2b0   : > { %vm1480_vm10 = vcmp.gt.f32.partialorder %v1463_v47, 0.0  ;;  %v1488_v54 = vmul.f32 0.2, %v1463_v47  ;;  %v1467_v56 = vadd.f32 %v1466_v52, %v1263_v42 }
 0x2b1   : > { %vm1481_vm11 = vcmp.gt.f32.partialorder %v1465_v51, 0.0  ;;  %v1489_v58 = vmul.f32 0.2, %v1465_v51  ;;  %v1495_v59 = vsel %vm1479_vm9, %v1461_v45, %v1487_v50 }
 0x2b2   : > { %vm1482_vm12 = vcmp.gt.f32.partialorder %v1467_v56, 0.0  ;;  %v1490_v60 = vmul.f32 0.2, %v1467_v56  ;;  %v1496_v61 = vsel %vm1480_vm10, %v1463_v47, %v1488_v54  ;;  %v1515_v62 = vmul.f32 %v1508_v49, %v1495_v59 }
 0x2b3   : > { %v1516_v63 = vmul.f32 %v1512_v53, %v1496_v61  ;;  %v1497_v0 = vsel %vm1481_vm11, %v1465_v51, %v1489_v58 }
 0x2b4   : > { %v1470_v1 = vpop.f32.mrb[12].mxu1  ;;  %v1498_v55 = vsel %vm1482_vm12, %v1467_v56, %v1490_v60  ;;  %v1517_v2 = vmul.f32 %v1508_v49, %v1497_v0 }
 0x2b5   : > { %v1471_v3 = vadd.f32 %v1470_v1, %v1259_v41  ;;  %v1472_v4 = vpop.f32.mrb[13].mxu1  ;;  %v1523_v5 = vadd.f32 %v1516_v63, %v1515_v62  ;;  %v1518_v6 = vmul.f32 %v1512_v53, %v1498_v55 }
 0x2b6   : > { %v1473_v57 = vadd.f32 %v1472_v4, %v1263_v42  ;;  %v1474_v7 = vpop.f32.mrb[14].mxu1 }
 0x2b7   : > { %vm1483_vm13 = vcmp.gt.f32.partialorder %v1471_v3, 0.0  ;;  %v1491_v8 = vmul.f32 0.2, %v1471_v3  ;;  %v1475_v9 = vadd.f32 %v1474_v7, %v1259_v41  ;;  %v1476_v10 = vpop.f32.mrb[15].mxu1  ;;  %1524 = vadd.xlane.f32.xlu0 %v1523_v5  ;;  %v1526_v11 = vadd.f32 %v1518_v6, %v1517_v2 }
 0x2b8   : > { %vm1484_vm14 = vcmp.gt.f32.partialorder %v1473_v57, 0.0  ;;  %v1492_v12 = vmul.f32 0.2, %v1473_v57  ;;  %v1477_v13 = vadd.f32 %v1476_v10, %v1263_v42 }
 0x2b9   : > { %vm1485_vm15 = vcmp.gt.f32.partialorder %v1475_v9, 0.0  ;;  %v1493_v14 = vmul.f32 0.2, %v1475_v9  ;;  %v1499_v15 = vsel %vm1483_vm13, %v1471_v3, %v1491_v8 }
 0x2ba   : > { %vm1486_vm0 = vcmp.gt.f32.partialorder %v1477_v13, 0.0  ;;  %v1494_v16 = vmul.f32 0.2, %v1477_v13  ;;  %v1500_v17 = vsel %vm1484_vm14, %v1473_v57, %v1492_v12  ;;  %v1519_v18 = vmul.f32 %v1508_v49, %v1499_v15 }
 0x2bb   : > { %1527 = vadd.xlane.f32.xlu0 %v1526_v11  ;;  %v1520_v19 = vmul.f32 %v1512_v53, %v1500_v17  ;;  %v1501_v20 = vsel %vm1485_vm15, %v1475_v9, %v1493_v14 }
 0x2bc   : > { %v1502_v21 = vsel %vm1486_vm0, %v1477_v13, %v1494_v16  ;;  %v1521_v22 = vmul.f32 %v1508_v49, %v1501_v20 }
 0x2bd   : > { %v1529_v23 = vadd.f32 %v1520_v19, %v1519_v18  ;;  %v1522_v24 = vmul.f32 %v1512_v53, %v1502_v21 }
 0x2bf   : > { %1530 = vadd.xlane.f32.xlu1 %v1529_v23  ;;  %v1532_v25 = vadd.f32 %v1522_v24, %v1521_v22 }
 0x2c3   : > { %1533 = vadd.xlane.f32.xlu1 %v1532_v25 }
 0x344   : > { %v1525_v27 = vpop.xlane.xlu0 %1524 }
 0x345   : > { %v1537_v28 = vadd.f32 %v1536_v26, %v1525_v27 }
 0x347   : > { %v1802_v29 = vmul.f32 -1.442695, %v1537_v28 }
 0x348   : > { %v1528_v30 = vpop.xlane.xlu0 %1527 }
 0x349   : > { %2103 = vpow2.f32 %v1802_v29  ;;  %v1538_v31 = vadd.f32 %v1536_v26, %v1528_v30 }
 0x34b   : > { %v1803_v32 = vmul.f32 -1.442695, %v1538_v31 }
 0x34c   : > { %v1531_v33 = vpop.xlane.xlu1 %1530 }
 0x34d   : > { %2105 = vpow2.f32 %v1803_v32  ;;  %v1539_v34 = vadd.f32 %v1536_v26, %v1531_v33 }
 0x34f   : > { %v1804_v35 = vmul.f32 -1.442695, %v1539_v34 }
 0x350   : > { %v1534_v36 = vpop.xlane.xlu1 %1533 }
 0x351   : > { %2107 = vpow2.f32 %v1804_v35  ;;  %v1540_v37 = vadd.f32 %v1536_v26, %v1534_v36 }
 0x353   : > { %v2104_v38 = vpop.eup %2103  ;;  %v1805_v39 = vmul.f32 -1.442695, %v1540_v37 }
 0x354   : > { %v1553_v40 = vadd.f32 1.0, %v2104_v38 }
 0x355   : > { %2109 = vpow2.f32 %v1805_v39 }
 0x356   : > { %2111 = vrcp.f32 %v1553_v40 }
 0x357   : > { %v2106_v41 = vpop.eup %2105 }
 0x358   : > { %v1554_v42 = vadd.f32 1.0, %v2106_v41 }
 0x35a   : > { %2113 = vrcp.f32 %v1554_v42 }
 0x35b   : > { %v2108_v43 = vpop.eup %2107 }
 0x35c   : > { %v1555_v44 = vadd.f32 1.0, %v2108_v43 }
 0x35e   : > { %2115 = vrcp.f32 %v1555_v44 }
 0x35f   : > { %v2110_v45 = vpop.eup %2109 }
 0x360   : > { %v2112_v46 = vpop.eup %2111  ;;  %v1556_v47 = vadd.f32 1.0, %v2110_v45 }
 0x361   : > { %1566 = vst.msk [vmem:[%s330_s29] sm:$0xff] %vm1565_vm1, %v2112_v46 }
 0x362   : > { %2117 = vrcp.f32 %v1556_v47 }
 0x364   : > { %v2114_v48 = vpop.eup %2113 }
 0x365   : > { %1567 = vst.msk [vmem:[%s330_s29 + $0x8] sm:$0xff] %vm1565_vm1, %v2114_v48 }
 0x368   : > { %v2116_v49 = vpop.eup %2115 }
 0x369   : > { %1568 = vst.msk [vmem:[%s330_s29 + $0x10] sm:$0xff] %vm1565_vm1, %v2116_v49 }
 0x36c   : > { %v2118_v50 = vpop.eup %2117 }
 0x36d   : > { %1569 = vst.msk [vmem:[%s330_s29 + $0x18] sm:$0xff] %vm1565_vm1, %v2118_v50 }
 0x36e PF: > { %p19_p6 = scmp.ge.s32.totalorder %s2392_s22, 4   ;;  %s2543_s26 = smov %s2235_s27 }
 0x36f   : > { %s2544_s27 = smov %s2239_s28  ;;  %s2545_s28 = smov %s2403_s10 }
 0x370   : > { %s2546_s29 = smov %s2392_s22  ;;  %21 = sbr.rel (!%p19_p6) target bundleno = 6 (0x6), region = 96 }
 0x377   :  { %1592 = vsyncpa [#allocation4], 1 }
 0x378   :  { %1594 = vsyncpa [#allocation4 + $0x1], 1 }
 0x379   :  { %1595 = vsyncpa [#allocation6], 1 }

</bundles_post_ra>
